<compile_context>
chip_gen: v7x
topology: tpu7x:2x2x1
jax: 0.10.0
libtpu: 0.0.40
codegen_flags: <defaults>
</compile_context>

<pallas_src>
import jax
import jax.numpy as jnp
from jax.experimental import pallas as pl
from jax.experimental.pallas import tpu as pltpu

_LANES = 128          # vreg lane width
_BLOCK_ROWS = 8192    # packed rows per grid step (multiple of 8)


def _logreg_kernel(x_ref, w_ref, b_ref, o_ref):
    # x_ref: (tb, pack*F) VMEM   -- lane-dense packed activations
    # w_ref: (pack*F, pack) VMEM -- block-diagonal weight, resident
    # b_ref: (1, pack)   VMEM    -- bias row, resident
    # o_ref: (tb, pack)  VMEM
    z = jnp.dot(x_ref[...], w_ref[...], preferred_element_type=jnp.float32)
    z = z + b_ref[...]                       # (tb, pack) + (1, pack) broadcast (VPU)
    # sigmoid(z) = 0.5 * (1 + tanh(z/2)): one EUP transcendental per vreg,
    # stable for large |z| (no exp overflow, no approximate reciprocal).
    y = 0.5 * (1.0 + jnp.tanh(0.5 * z))
    o_ref[...] = y.astype(o_ref.dtype)


def logistic_regression(x, w, b, *, block_rows=_BLOCK_ROWS):
    """Forward pass: sigmoid(x @ w.T + b), PyTorch nn.Linear(in_features, 1) layout.

    x: (B, F) float32,  w: (1, F) float32,  b: (1,) float32  ->  (B, 1) float32
    """
    B, F = x.shape
    assert w.shape == (1, F), w.shape
    assert b.shape == (1,), b.shape
    dtype = x.dtype

    # Pack factor: how many logical rows share one 128-lane vreg row.
    pack = _LANES // F if (F <= _LANES and _LANES % F == 0) else 1

    # Pad B to a multiple of `pack` (copies x only when B % pack != 0).
    Bp = ((B + pack - 1) // pack) * pack
    if Bp != B:
        x = jnp.pad(x, ((0, Bp - B), (0, 0)))
    rows = Bp // pack
    x_packed = x.reshape(rows, pack * F)            # free row-major reshape

    # Block-diagonal weight (pack*F, pack): column j carries w in rows j*F:(j+1)*F,
    # so (x_packed @ w_blk)[r, j] == dot(x[r*pack + j], w).  Built once, resident.
    w_blk = jnp.kron(jnp.eye(pack, dtype=dtype), w.reshape(F, 1).astype(dtype))
    b_row = jnp.full((1, pack), b[0], dtype=dtype)  # resident bias row

    # Full-array block for small inputs, otherwise a fixed tile of block_rows.
    tb = rows if rows <= block_rows else block_rows
    if tb != rows:
        assert tb % 8 == 0, "block_rows must be a multiple of 8"
    grid = (pl.cdiv(rows, tb),)

    out_packed = pl.pallas_call(
        _logreg_kernel,
        out_shape=jax.ShapeDtypeStruct((rows, pack), dtype),
        grid=grid,
        in_specs=[
            # Batch-tiled, lane-dense x: DMA of tile i+1 overlaps compute on tile i.
            pl.BlockSpec((tb, pack * F), lambda i: (i, 0)),
            # Weight / bias: same block every step -> stay resident in VMEM.
            pl.BlockSpec((pack * F, pack), lambda i: (0, 0)),
            pl.BlockSpec((1, pack), lambda i: (0, 0)),
        ],
        out_specs=pl.BlockSpec((tb, pack), lambda i: (i, 0)),
        compiler_params=pltpu.CompilerParams(
            # Independent batch tiles -> shard across both TensorCores on v7x.
            dimension_semantics=("parallel",),
            # Default tile footprint ~8.3 MiB double-buffered: fits every
            # generation (incl. v7x's 64 MiB physical VMEM) with headroom.
            vmem_limit_bytes=32 * 1024 * 1024,
        ),
    )(x_packed, w_blk, b_row)

    # (rows, pack) -> (Bp, 1) is the inverse free reshape; drop padded rows.
    return out_packed.reshape(Bp, 1)[:B]


def _reference(x, w, b):
    return jax.nn.sigmoid(x @ w.T + b)


if __name__ == "__main__":
    in_features = 32

    key = jax.random.PRNGKey(0)
    kx, kw, kb, kx2 = jax.random.split(key, 4)

    # Deterministic init mimicking nn.Linear default U(-1/sqrt(F), 1/sqrt(F)).
    bound = 1.0 / (in_features ** 0.5)
    w = jax.random.uniform(kw, (1, in_features), jnp.float32, -bound, bound)
    b = jax.random.uniform(kb, (1,), jnp.float32, -bound, bound)

    # Small shape consistent with the module (single grid step, full-array block).
    batch = 8
    x = jax.random.normal(kx, (batch, in_features), jnp.float32)
    y = jax.block_until_ready(logistic_regression(x, w, b))
    y_ref = _reference(x, w, b)
    assert y.shape == (batch, 1), y.shape
    assert jnp.allclose(y, y_ref, atol=1e-5, rtol=1e-5), "mismatch (small batch)"

    # Moderate batch with a reduced tile: exercises the multi-step pipelined
    # grid, a partial last block, and a B that is not a multiple of the pack.
    batch2 = 1234
    x2 = jax.random.normal(kx2, (batch2, in_features), jnp.float32)
    y2 = jax.block_until_ready(logistic_regression(x2, w, b, block_rows=128))
    y2_ref = _reference(x2, w, b)
    assert y2.shape == (batch2, 1), y2.shape
    assert jnp.allclose(y2, y2_ref, atol=1e-5, rtol=1e-5), "mismatch (tiled batch)"

    print("KERNEL_OK")
</pallas_src>

<mosaic_0001>
module attributes {stable_mosaic.version = 11 : i64} {
  func.func @_logreg_kernel(%arg0: i32, %arg1: memref<2x128xf32, #tpu.memory_space<vmem>>, %arg2: memref<128x4xf32, #tpu.memory_space<vmem>>, %arg3: memref<1x4xf32, #tpu.memory_space<vmem>>, %arg4: memref<2x4xf32, #tpu.memory_space<vmem>>) attributes {dimension_semantics = [#tpu.dimension_semantics<parallel>], iteration_bounds = array<i64: 1>, scalar_prefetch = 0 : i64, scratch_operands = 0 : i64, tpu.core_type = #tpu.core_type<tc>, window_params = [{transform_indices = @transform_0, window_bounds = array<i64: 2, 128>}, {pipeline_mode = #tpu.pipeline_mode<synchronous>, transform_indices = @transform_1, window_bounds = array<i64: 128, 4>}, {pipeline_mode = #tpu.pipeline_mode<synchronous>, transform_indices = @transform_2, window_bounds = array<i64: 1, 4>}, {transform_indices = @transform_3, window_bounds = array<i64: 2, 4>}]} {
    %c0 = arith.constant 0 : index
    %c0_0 = arith.constant 0 : index
    %0 = vector.load %arg1[%c0, %c0_0] : memref<2x128xf32, #tpu.memory_space<vmem>>, vector<2x128xf32>
    %c0_1 = arith.constant 0 : index
    %c0_2 = arith.constant 0 : index
    %1 = vector.load %arg2[%c0_1, %c0_2] : memref<128x4xf32, #tpu.memory_space<vmem>>, vector<128x4xf32>
    %cst = arith.constant dense<0.000000e+00> : vector<2x4xf32>
    %2 = tpu.matmul %0, %1, %cst {dimension_numbers = #tpu.dot_dimension_numbers<[1], [0], [0], [1], [0, 0, 1, 1], [], []>} : vector<2x128xf32>, vector<128x4xf32>, vector<2x4xf32> -> vector<2x4xf32>
    %c0_3 = arith.constant 0 : index
    %c0_4 = arith.constant 0 : index
    %3 = vector.load %arg3[%c0_3, %c0_4] : memref<1x4xf32, #tpu.memory_space<vmem>>, vector<1x4xf32>
    %4 = vector.broadcast %3 : vector<1x4xf32> to vector<2x4xf32>
    %5 = arith.addf %2, %4 : vector<2x4xf32>
    %cst_5 = arith.constant 5.000000e-01 : f32
    %6 = vector.broadcast %cst_5 : f32 to vector<2x4xf32>
    %7 = arith.mulf %6, %5 : vector<2x4xf32>
    %8 = math.tanh %7 : vector<2x4xf32>
    %cst_6 = arith.constant 1.000000e+00 : f32
    %9 = vector.broadcast %cst_6 : f32 to vector<2x4xf32>
    %10 = arith.addf %9, %8 : vector<2x4xf32>
    %cst_7 = arith.constant 5.000000e-01 : f32
    %11 = vector.broadcast %cst_7 : f32 to vector<2x4xf32>
    %12 = arith.mulf %11, %10 : vector<2x4xf32>
    %c0_8 = arith.constant 0 : index
    %c0_9 = arith.constant 0 : index
    %13 = vector.load %arg4[%c0_8, %c0_9] : memref<2x4xf32, #tpu.memory_space<vmem>>, vector<2x4xf32>
    tpu.vector_store %arg4[%c0_8, %c0_9], %12 {strides = array<i32>} : memref<2x4xf32, #tpu.memory_space<vmem>>, vector<2x4xf32>,
    return
  }
  func.func @transform_0(%arg0: i32) -> (i32, i32) {
    %c0_i32 = arith.constant 0 : i32
    %c0_i32_0 = arith.constant 0 : i32
    return %arg0, %c0_i32 : i32, i32
  }
  func.func @transform_1(%arg0: i32) -> (i32, i32) {
    %c0_i32 = arith.constant 0 : i32
    %c0_i32_0 = arith.constant 0 : i32
    %c0_i32_1 = arith.constant 0 : i32
    return %c0_i32, %c0_i32_0 : i32, i32
  }
  func.func @transform_2(%arg0: i32) -> (i32, i32) {
    %c0_i32 = arith.constant 0 : i32
    %c0_i32_0 = arith.constant 0 : i32
    %c0_i32_1 = arith.constant 0 : i32
    return %c0_i32, %c0_i32_0 : i32, i32
  }
  func.func @transform_3(%arg0: i32) -> (i32, i32) {
    %c0_i32 = arith.constant 0 : i32
    %c0_i32_0 = arith.constant 0 : i32
    return %arg0, %c0_i32 : i32, i32
  }
}

</mosaic_0001>

<bundles_post_ra>
// kernel: tpu_custom_call.1
= control target key start
LH: loop header
LB: loop body
LE: loop exit
PB: predicated region body
PF: predicated region fallthrough
CT: control target
= control target key end

     0   :  { %v236_v3 = vmov 0.0|0.0   ;;  %vm237_vm0 = vmmov 0   ;;  %v238_v6 = vmov 0.0   ;;  %s326_s0 = inlined_call_operand.vmem [shape: f32[2,128], index: 0, kind: input, shape index: {}]   ;;  %s327_s1 = inlined_call_operand.vmem [shape: f32[128,4], index: 1, kind: input, shape index: {}]   ;;  %s328_s2 = inlined_call_operand.vmem [shape: f32[1,4], index: 2, kind: input, shape index: {}]   ;;  %s329_s3 = inlined_call_operand.hbm [shape: f32[2,4], index: 3, kind: output, shape index: {}]  }
   0x1   :  { %v16_v0 = vld [vmem:[%s327_s1] sm:$0xff]  ;;  %v17_v1 = vld [vmem:[%s327_s1 + $0x8] sm:$0xff]  ;;  %v18_v2 = vld [vmem:[%s327_s1 + $0x10] sm:$0xff]  ;;  %182 = vmatprep.subr.bf16.mxu0 %v236_v3  ;;  %179 = vmatprep.mubr.msk.f32.mxu0 %vm237_vm0, %v238_v6 }
   0x2   :  { %v183_v4 = vpack.c.bf16 %v17_v1, %v16_v0  ;;  %v19_v5 = vld [vmem:[%s327_s1 + $0x18] sm:$0xff]  ;;  %v20_v8 = vld [vmem:[%s327_s1 + $0x20] sm:$0xff]  ;;  %v21_v9 = vld [vmem:[%s327_s1 + $0x28] sm:$0xff] }
   0x3   :  { %v186_v7 = vpack.c.bf16 %v19_v5, %v18_v2 }
   0x4   :  { %184 = vmatpush3.bf16.msra.mxu0 %v183_v4 }
   0x5   :  { %185 = vmatprep.subr.bf16.mxu0 %v236_v3 }
   0x6   :  { %8 = vsyncpa [#allocation3], 0  ;;  %v189_v10 = vpack.c.bf16 %v21_v9, %v20_v8  ;;  %v22_v11 = vld [vmem:[%s327_s1 + $0x30] sm:$0xff]  ;;  %v23_v12 = vld [vmem:[%s327_s1 + $0x38] sm:$0xff]  ;;  %vm113_vm1 = vcmask 25600  }
   0x7   :  { %v192_v13 = vpack.c.bf16 %v23_v12, %v22_v11  ;;  %v24_v14 = vld [vmem:[%s327_s1 + $0x40] sm:$0xff]  ;;  %v25_v15 = vld [vmem:[%s327_s1 + $0x48] sm:$0xff]  ;;  %v26_v17 = vld [vmem:[%s327_s1 + $0x50] sm:$0xff] }
   0x8   :  { %187 = vmatpush3.bf16.msra.mxu0 %v186_v7  ;;  %v195_v16 = vpack.c.bf16 %v25_v15, %v24_v14  ;;  %v27_v18 = vld [vmem:[%s327_s1 + $0x58] sm:$0xff]  ;;  %v28_v20 = vld [vmem:[%s327_s1 + $0x60] sm:$0xff]  ;;  %v29_v21 = vld [vmem:[%s327_s1 + $0x68] sm:$0xff] }
   0x9   :  { %188 = vmatprep.subr.bf16.mxu0 %v236_v3  ;;  %v198_v19 = vpack.c.bf16 %v27_v18, %v26_v17  ;;  %v201_v22 = vpack.c.bf16 %v29_v21, %v28_v20  ;;  %v30_v23 = vld [vmem:[%s327_s1 + $0x70] sm:$0xff]  ;;  %v31_v24 = vld [vmem:[%s327_s1 + $0x78] sm:$0xff]  ;;  %v15_v26 = vld [vmem:[%s326_s0] sm:$0x3]  ;;  %s239_s1 = smov [#allocation2]  }
   0xa   :  { %v204_v25 = vpack.c.bf16 %v31_v24, %v30_v23  ;;  %v129_v27 = vld [vmem:[%s328_s2] ss:$0 sm:$0xff]  ;;  %s121_s21 = sshll.u32 %s239_s1, 4  ;;  %s122_s21 = int_to_ptr.vmem [resolvable:$true] %s121_s21 }
   0xb   :  { %s212_s22 = scalar_lea.vmem %s122_s21, 32  ;;  %p217_p1 = scmp.lt.s32.totalorder %s122_s21, %s122_s21 }
   0xc   :  { %190 = vmatpush3.bf16.msra.mxu0 %v189_v10  ;;  %p213_p0 = scmp.ne.s32.totalorder %s122_s21, %s212_s22  ;;  %p218_p2 = scmp.lt.s32.totalorder %s212_s22, %s212_s22 }
   0xd   :  { %191 = vmatprep.subr.bf16.mxu0 %v236_v3 }
   0xe   :  { %p219_p3 = por %p218_p2, %p217_p1 }
  0x10   :  { %193 = vmatpush3.bf16.msra.mxu0 %v192_v13  ;;  %p220_p4 = pnand %p219_p3, %p213_p0 }
  0x11   :  { %194 = vmatprep.subr.bf16.mxu0 %v236_v3 }
  0x14   :  { %196 = vmatpush3.bf16.msra.mxu0 %v195_v16 }
  0x15   :  { %197 = vmatprep.subr.bf16.mxu0 %v236_v3 }
  0x18   :  { %199 = vmatpush3.bf16.msra.mxu0 %v198_v19 }
  0x19   :  { %200 = vmatprep.subr.bf16.mxu0 %v236_v3 }
  0x1c   :  { %202 = vmatpush3.bf16.msra.mxu0 %v201_v22 }
  0x1d   :  { %203 = vmatprep.subr.bf16.mxu0 %v236_v3 }
  0x20   :  { %205 = vmatpush3.bf16.msra.mxu0 %v204_v25 }
  0x23   :  { %180 = vmatmul.mubr.f32.vlgmr.msra.gmra.mrb[0].mxu0 %v15_v26 }
  0xf6   :  { %v105_v28 = vpop.f32.mrb[0].mxu0 }
  0xf7   :  { %v106_v29 = vadd.f32 %v129_v27, %v105_v28  ;;  %v181_v30 = vpop.f32.mrb[1].mxu0 }
  0xf9   :  { %v109_v31 = vmul.f32 0.5, %v106_v29 }
  0xfb   :  { %210 = vtanh.f32 %v109_v31 }
 0x105   :  { %v211_v32 = vpop.eup %210 }
 0x106   :  { %v111_v33 = vadd.f32 1.0, %v211_v32 }
 0x108   :  { %v112_v34 = vmul.f32 0.5, %v111_v33 }
 0x10a   :  { %114 = vst.msk [vmem:[#allocation2] sm:$0x3] %vm113_vm1, %v112_v34 }
 0x10b   :  { %223 = shalt.err (!%p220_p4)
}
 0x10c   :  { %s224_s23 = scalar_lea.hbm %s329_s3, 32 }
 0x10d   :  { %p225_p5 = scmp.ne.s32.totalorder %s329_s3, %s224_s23  ;;  %p228_p6 = scmp.lt.u32.totalorder %s224_s23, %s329_s3 }
 0x10f   :  { %p230_p7 = pnand %p228_p6, %p225_p5 }
 0x111   :  { %233 = shalt.err (!%p230_p7)
}
 0x112   :  { %124 = dma.vmem_to_hbm [thread:$0]  %s122_s21, 32, %s329_s3, [#allocation3]  }
 0x113   :  { %234 = dma.done.wait [#allocation3], 32  }
 0x114   :  { %235 = vsyncadd [#allocation3], 4294967264 }
 0x115   :  { %128 = vsyncpa [#allocation3], 1 }

</bundles_post_ra>
